<compile_context>
chip_gen: v7x
topology: tpu7x:2x2x1
jax: 0.10.0
libtpu: 0.0.40
codegen_flags: <defaults>
</compile_context>

<pallas_src>
import jax
import jax.numpy as jnp
from jax.experimental import pallas as pl
from jax.experimental.pallas import tpu as pltpu


def _make_kernel(s_total, s_tile, j_inner, needs_mask):
    """Kernel closing over static layout parameters."""

    def kernel(x_ref, t_ref, m_ref, o_ref):
        # x_ref, t_ref: (1, C, s_tile, 128) tiles; m_ref: (1, 1, s_tile, 128)
        # o_ref:        (1, 1, 1, 1) per-(batch, core-split) partial sum (f32)
        p = pl.program_id(1)
        j = pl.program_id(2)

        @pl.when(j == 0)
        def _():
            o_ref[...] = jnp.zeros_like(o_ref)

        # Subtract/abs in the native streaming dtype (packed bf16 on v6e/v7x),
        # upcast to f32 only for the channel sum + accumulation.
        d = jnp.abs(x_ref[...] - t_ref[...]).astype(jnp.float32)  # (1,C,S_T,128)
        d_c = jnp.sum(d, axis=1)                                   # (1,S_T,128)

        # |(x-t)*m| == |x-t| * |m| exactly; one mask multiply per lane
        # (hoisted out of the channel dimension).
        m = jnp.abs(m_ref[...].astype(jnp.float32))[:, 0]          # (1,S_T,128)
        contrib = d_c * m

        if needs_mask:
            # Ragged tail / clamped duplicate blocks: zero invalid S rows AFTER
            # the multiply so garbage (possibly NaN) OOB data never contributes.
            s0 = (p * j_inner + j) * s_tile
            s_idx = jax.lax.broadcasted_iota(jnp.int32, contrib.shape, 1)
            contrib = jnp.where(s0 + s_idx < s_total, contrib, 0.0)

        o_ref[...] = o_ref[...] + jnp.sum(contrib)

    return kernel


def masked_l1_loss(inp, target, mask, *, s_tile_override=None):
    """inp, target: (N, C, H, W); mask: (N, 1, H, W). Returns scalar mean L1 (f32)."""
    N, C, H, W = inp.shape
    HW = H * W
    elem_bytes = jnp.dtype(inp.dtype).itemsize

    # ---- layout: fold spatial into (S, 128) so vregs are lane- AND sublane-dense.
    if HW % 128 == 0:
        hw_pad = HW                          # pure reshape, no HBM traffic
    else:
        # Rare fallback: pad to the next lane multiple (one extra HBM pass).
        # Padded x/t/mask are zero, contribute nothing; mean uses true count.
        hw_pad = ((HW + 127) // 128) * 128
    S = hw_pad // 128

    x2 = inp.reshape(N, C, HW)
    t2 = target.reshape(N, C, HW)
    m2 = mask.reshape(N, 1, HW)
    if hw_pad != HW:
        pad = ((0, 0), (0, 0), (0, hw_pad - HW))
        x2, t2, m2 = jnp.pad(x2, pad), jnp.pad(t2, pad), jnp.pad(m2, pad)
    x4 = x2.reshape(N, C, S, 128)
    t4 = t2.reshape(N, C, S, 128)
    m4 = m2.reshape(N, 1, S, 128)

    # ---- S-tile sized from a VMEM budget (double-buffered x + t + mask blocks).
    bytes_per_srow = (2 * C + 1) * 128 * elem_bytes
    budget = 16 * 1024 * 1024                 # safe inside every generation's VMEM
    s_tile = budget // (2 * bytes_per_srow)
    s_tile = (s_tile // 32) * 32              # sublane multiple for f32/bf16/int8
    if s_tile <= 0:
        s_tile = 32  # TODO(synk): block the channel axis instead for very large C
    if s_tile_override is not None:
        s_tile = int(s_tile_override)
    s_tile = min(s_tile, S)                   # == S (full dim) is always legal

    J = pl.cdiv(S, s_tile)                    # number of real S chunks
    # Extra parallel axis so both v7x TensorCores get work even when N == 1.
    P = 2 if (N == 1 and J >= 2) else 1
    Ji = pl.cdiv(J, P)                        # S chunks per (n, p) program
    needs_mask = (P * Ji * s_tile != S)       # ragged tail or overflow blocks exist

    def sblock(p, j):
        # Clamp so a (p, j) past the real chunk range re-reads the last block
        # (its contribution is zeroed in-kernel) instead of issuing an OOB DMA.
        return jnp.minimum(p * Ji + j, J - 1)

    grid = (N, P, Ji)

    footprint = 2 * (2 * C + 1) * s_tile * 128 * elem_bytes
    vmem_limit = int(min(48 * 1024 * 1024,
                         max(32 * 1024 * 1024, footprint + 4 * 1024 * 1024)))

    cost = pl.CostEstimate(
        flops=4 * N * C * hw_pad + 2 * N * hw_pad,   # sub+abs+cast+chan-add, mask mul+reduce
        transcendentals=0,
        bytes_accessed=(2 * N * C * hw_pad + N * hw_pad) * elem_bytes + N * P * 4,
    )

    kernel = _make_kernel(S, s_tile, Ji, needs_mask)

    partials = pl.pallas_call(
        kernel,
        out_shape=jax.ShapeDtypeStruct((N, P, 1, 1), jnp.float32),
        grid_spec=pltpu.PrefetchScalarGridSpec(
            num_scalar_prefetch=0,
            grid=grid,
            in_specs=[
                pl.BlockSpec((1, C, s_tile, 128), lambda n, p, j: (n, 0, sblock(p, j), 0)),
                pl.BlockSpec((1, C, s_tile, 128), lambda n, p, j: (n, 0, sblock(p, j), 0)),
                pl.BlockSpec((1, 1, s_tile, 128), lambda n, p, j: (n, 0, sblock(p, j), 0)),
            ],
            out_specs=pl.BlockSpec((1, 1, 1, 1), lambda n, p, j: (n, p, 0, 0)),
        ),
        compiler_params=pltpu.CompilerParams(
            # N and the core-split axis are independent (megacore / 2 TCs on v7x);
            # the S-chunk axis carries the resident output accumulator.
            dimension_semantics=("parallel", "parallel", "arbitrary"),
            vmem_limit_bytes=vmem_limit,
        ),
        cost_estimate=cost,
    )(x4, t4, m4)

    # nn.L1Loss(reduction='mean'): divide by the true (unpadded) element count.
    return jnp.sum(partials) / jnp.float32(N * C * H * W)


def _ref_loss(x, t, m):
    N, C, H, W = x.shape
    me = jnp.broadcast_to(m, (N, C, H, W)).astype(jnp.float32)
    return jnp.mean(jnp.abs(x.astype(jnp.float32) * me - t.astype(jnp.float32) * me))


if __name__ == "__main__":
    key = jax.random.PRNGKey(0)
    k1, k2, k3 = jax.random.split(key, 3)

    # --- main demo shapes (HW % 128 == 0 -> no pad, single S chunk) ------------
    N, C, H, W = 2, 4, 16, 16
    x = jax.random.normal(k1, (N, C, H, W), dtype=jnp.float32)
    t = jax.random.normal(k2, (N, C, H, W), dtype=jnp.float32)
    m = (jax.random.uniform(k3, (N, 1, H, W)) > 0.5).astype(jnp.float32)

    loss = jax.block_until_ready(masked_l1_loss(x, t, m))
    ref = _ref_loss(x, t, m)
    assert jnp.allclose(loss, ref, rtol=1e-4, atol=1e-6), (loss, ref)

    # --- bf16 streaming path (half HBM bytes; packed bf16 sub/abs on v6e/v7x) --
    xb, tb, mb = (a.astype(jnp.bfloat16) for a in (x, t, m))
    loss_b = jax.block_until_ready(masked_l1_loss(xb, tb, mb))
    # subtract happens in bf16 inside the kernel -> compare loosely to f32 ref
    assert jnp.allclose(loss_b, ref, rtol=2e-2, atol=1e-3), (loss_b, ref)

    # --- N == 1: exercises the 2-way core-split axis, ragged S tail and the
    # --- clamped overflow block (S=40, s_tile=16 -> J=3, P=2, Ji=2) ------------
    N2, C2, H2, W2 = 1, 3, 40, 128
    x3 = jax.random.normal(k1, (N2, C2, H2, W2), dtype=jnp.float32)
    t3 = jax.random.normal(k2, (N2, C2, H2, W2), dtype=jnp.float32)
    m3 = (jax.random.uniform(k3, (N2, 1, H2, W2)) > 0.3).astype(jnp.float32)
    loss3 = jax.block_until_ready(masked_l1_loss(x3, t3, m3, s_tile_override=16))
    ref3 = _ref_loss(x3, t3, m3)
    assert jnp.allclose(loss3, ref3, rtol=1e-4, atol=1e-6), (loss3, ref3)

    # --- HW not divisible by 128: exercises the (rare) pad fallback ------------
    N4, C4, H4, W4 = 2, 3, 10, 10
    x5 = jax.random.normal(k1, (N4, C4, H4, W4), dtype=jnp.float32)
    t5 = jax.random.normal(k2, (N4, C4, H4, W4), dtype=jnp.float32)
    m5 = (jax.random.uniform(k3, (N4, 1, H4, W4)) > 0.5).astype(jnp.float32)
    loss5 = jax.block_until_ready(masked_l1_loss(x5, t5, m5))
    ref5 = _ref_loss(x5, t5, m5)
    assert jnp.allclose(loss5, ref5, rtol=1e-4, atol=1e-6), (loss5, ref5)

    print("KERNEL_OK")
</pallas_src>

<mosaic_0001>
module attributes {stable_mosaic.version = 11 : i64} {
  func.func @kernel(%arg0: i32, %arg1: i32, %arg2: i32, %arg3: memref<1x4x2x128xf32, #tpu.memory_space<vmem>>, %arg4: memref<1x4x2x128xf32, #tpu.memory_space<vmem>>, %arg5: memref<1x1x2x128xf32, #tpu.memory_space<vmem>>, %arg6: memref<1x1x1x1xf32, #tpu.memory_space<vmem>>) attributes {dimension_semantics = [#tpu.dimension_semantics<parallel>, #tpu.dimension_semantics<parallel>, #tpu.dimension_semantics<arbitrary>], iteration_bounds = array<i64: 2, 1, 1>, scalar_prefetch = 0 : i64, scratch_operands = 0 : i64, tpu.core_type = #tpu.core_type<tc>, window_params = [{transform_indices = @transform_0, window_bounds = array<i64: 1, 4, 2, 128>}, {transform_indices = @transform_1, window_bounds = array<i64: 1, 4, 2, 128>}, {transform_indices = @transform_2, window_bounds = array<i64: 1, 1, 2, 128>}, {transform_indices = @transform_3, window_bounds = array<i64: 1, 1, 1, 1>}]} {
    %c0_i32 = arith.constant 0 : i32
    %0 = arith.cmpi eq, %arg2, %c0_i32 : i32
    %1 = arith.extui %0 : i1 to i32
    %c0_i32_0 = arith.constant 0 : i32
    %2 = arith.cmpi ne, %1, %c0_i32_0 : i32
    scf.if %2 {
      %cst_21 = arith.constant 0.000000e+00 : f32
      %20 = vector.broadcast %cst_21 : f32 to vector<1x1x1x1xf32>
      %c0_22 = arith.constant 0 : index
      %c0_23 = arith.constant 0 : index
      %c0_24 = arith.constant 0 : index
      %c0_25 = arith.constant 0 : index
      %21 = vector.load %arg6[%c0_22, %c0_23, %c0_24, %c0_25] : memref<1x1x1x1xf32, #tpu.memory_space<vmem>>, vector<1x1x1x1xf32>
      tpu.vector_store %arg6[%c0_22, %c0_23, %c0_24, %c0_25], %20 {strides = array<i32>} : memref<1x1x1x1xf32, #tpu.memory_space<vmem>>, vector<1x1x1x1xf32>,
    } else {
    }
    %c0 = arith.constant 0 : index
    %c0_1 = arith.constant 0 : index
    %c0_2 = arith.constant 0 : index
    %c0_3 = arith.constant 0 : index
    %3 = vector.load %arg3[%c0, %c0_1, %c0_2, %c0_3] : memref<1x4x2x128xf32, #tpu.memory_space<vmem>>, vector<1x4x2x128xf32>
    %c0_4 = arith.constant 0 : index
    %c0_5 = arith.constant 0 : index
    %c0_6 = arith.constant 0 : index
    %c0_7 = arith.constant 0 : index
    %4 = vector.load %arg4[%c0_4, %c0_5, %c0_6, %c0_7] : memref<1x4x2x128xf32, #tpu.memory_space<vmem>>, vector<1x4x2x128xf32>
    %5 = arith.subf %3, %4 : vector<1x4x2x128xf32>
    %6 = math.absf %5 : vector<1x4x2x128xf32>
    %cst = arith.constant dense<0.000000e+00> : vector<1x2x128xf32>
    %7 = vector.multi_reduction <add>, %6, %cst [1] : vector<1x4x2x128xf32> to vector<1x2x128xf32>
    %c0_8 = arith.constant 0 : index
    %c0_9 = arith.constant 0 : index
    %c0_10 = arith.constant 0 : index
    %c0_11 = arith.constant 0 : index
    %8 = vector.load %arg5[%c0_8, %c0_9, %c0_10, %c0_11] : memref<1x1x2x128xf32, #tpu.memory_space<vmem>>, vector<1x1x2x128xf32>
    %9 = math.absf %8 : vector<1x1x2x128xf32>
    %10 = vector.shape_cast %9 : vector<1x1x2x128xf32> to vector<1x2x128xf32>
    %11 = arith.mulf %7, %10 : vector<1x2x128xf32>
    %c0_12 = arith.constant 0 : index
    %c0_13 = arith.constant 0 : index
    %c0_14 = arith.constant 0 : index
    %c0_15 = arith.constant 0 : index
    %12 = vector.load %arg6[%c0_12, %c0_13, %c0_14, %c0_15] : memref<1x1x1x1xf32, #tpu.memory_space<vmem>>, vector<1x1x1x1xf32>
    %13 = vector.shape_cast %11 : vector<1x2x128xf32> to vector<1x1x2x128xf32>
    %cst_16 = arith.constant dense<0.000000e+00> : vector<1xf32>
    %14 = vector.multi_reduction <add>, %13, %cst_16 [1, 2, 3] : vector<1x1x2x128xf32> to vector<1xf32>
    %15 = vector.shape_cast %14 : vector<1xf32> to vector<1x1x1x1xf32>
    %16 = vector.extract %15[0, 0, 0, 0] : f32 from vector<1x1x1x1xf32>
    %17 = vector.broadcast %16 : f32 to vector<1x1x1x1xf32>
    %18 = arith.addf %12, %17 : vector<1x1x1x1xf32>
    %c0_17 = arith.constant 0 : index
    %c0_18 = arith.constant 0 : index
    %c0_19 = arith.constant 0 : index
    %c0_20 = arith.constant 0 : index
    %19 = vector.load %arg6[%c0_17, %c0_18, %c0_19, %c0_20] : memref<1x1x1x1xf32, #tpu.memory_space<vmem>>, vector<1x1x1x1xf32>
    tpu.vector_store %arg6[%c0_17, %c0_18, %c0_19, %c0_20], %18 {strides = array<i32>} : memref<1x1x1x1xf32, #tpu.memory_space<vmem>>, vector<1x1x1x1xf32>,
    return
  }
  func.func @transform_0(%arg0: i32, %arg1: i32, %arg2: i32) -> (i32, i32, i32, i32) {
    %c1_i32 = arith.constant 1 : i32
    %0 = arith.muli %arg1, %c1_i32 : i32
    %1 = arith.addi %0, %arg2 : i32
    %c0_i32 = arith.constant 0 : i32
    %2 = arith.minsi %1, %c0_i32 : i32
    %c0_i32_0 = arith.constant 0 : i32
    %c0_i32_1 = arith.constant 0 : i32
    %c0_i32_2 = arith.constant 0 : i32
    return %arg0, %c0_i32_0, %2, %c0_i32_1 : i32, i32, i32, i32
  }
  func.func @transform_1(%arg0: i32, %arg1: i32, %arg2: i32) -> (i32, i32, i32, i32) {
    %c1_i32 = arith.constant 1 : i32
    %0 = arith.muli %arg1, %c1_i32 : i32
    %1 = arith.addi %0, %arg2 : i32
    %c0_i32 = arith.constant 0 : i32
    %2 = arith.minsi %1, %c0_i32 : i32
    %c0_i32_0 = arith.constant 0 : i32
    %c0_i32_1 = arith.constant 0 : i32
    %c0_i32_2 = arith.constant 0 : i32
    return %arg0, %c0_i32_0, %2, %c0_i32_1 : i32, i32, i32, i32
  }
  func.func @transform_2(%arg0: i32, %arg1: i32, %arg2: i32) -> (i32, i32, i32, i32) {
    %c1_i32 = arith.constant 1 : i32
    %0 = arith.muli %arg1, %c1_i32 : i32
    %1 = arith.addi %0, %arg2 : i32
    %c0_i32 = arith.constant 0 : i32
    %2 = arith.minsi %1, %c0_i32 : i32
    %c0_i32_0 = arith.constant 0 : i32
    %c0_i32_1 = arith.constant 0 : i32
    %c0_i32_2 = arith.constant 0 : i32
    return %arg0, %c0_i32_0, %2, %c0_i32_1 : i32, i32, i32, i32
  }
  func.func @transform_3(%arg0: i32, %arg1: i32, %arg2: i32) -> (i32, i32, i32, i32) {
    %c0_i32 = arith.constant 0 : i32
    %c0_i32_0 = arith.constant 0 : i32
    %c0_i32_1 = arith.constant 0 : i32
    return %arg0, %arg1, %c0_i32, %c0_i32_0 : i32, i32, i32, i32
  }
}

</mosaic_0001>

<bundles_post_ra>
// kernel: tpu_custom_call.1
= control target key start
LH: loop header
LB: loop body
LE: loop exit
PB: predicated region body
PF: predicated region fallthrough
CT: control target
= control target key end

     0   :  { %8 = vsyncpa [#allocation3], 0  ;;  %s918_s0 = inlined_call_operand.hbm [shape: f32[2,4,2,128], index: 0, kind: input, shape index: {}]   ;;  %s919_s1 = inlined_call_operand.hbm [shape: f32[2,4,2,128], index: 1, kind: input, shape index: {}]   ;;  %s920_s2 = inlined_call_operand.vmem [shape: f32[2,1,2,128], index: 2, kind: input, shape index: {}]   ;;  %s921_s3 = inlined_call_operand.vmem [shape: f32[2,1,1,1], index: 3, kind: output, shape index: {}]  }
   0x1   :  { %10 = vsyncpa [#allocation3 + $0x1], 0 }
   0x2   :  { %11 = vsyncpa [#allocation5], 0 }
   0x3   :  { %13 = vsyncpa [#allocation5 + $0x1], 0  ;;  %s727_s12 = smov 0   ;;  %s729_s13 = smov 0  }
   0x4   :  { %s731_s14 = smov 0   ;;  %s733_s15 = smov 0  }
   0x5   :  { %s735_s16 = smov 0   ;;  %s737_s17 = smov 0  }
   0x6 LB: > { %s503_s18 = sadd.s32 4294967295, %s700_s17   ;;  %s38_s19 = sadd.s32 1, %s696_s16  ;;  %s700_s17 = sphi %s737_s17, %s19_s17   ;;  %s696_s16 = sphi %s735_s16, %s932_s16   ;;  %s692_s15 = sphi %s733_s15, %s931_s15   ;;  %s688_s14 = sphi %s731_s14, %s930_s14   ;;  %s684_s13 = sphi %s729_s13, %s929_s13   ;;  %s680_s12 = sphi %s727_s12, %s928_s12  }
   0x7   : > { %p40_p0 = scmp.ge.s32.totalorder %s38_s19, 2  ;;  %s53_s20 = sadd.s32 1, %s688_s14 }
   0x8   : > { %p60_p1 = scmp.ne.s32.totalorder %s688_s14, %s684_s13  ;;  %p61_p2 = scmp.eq.s32.totalorder %s700_s17, 0 }
   0x9   : > { %s934_s19 = smov (%p40_p0, %s38_s19), 0  ;;  %p66_p4 = scmp.ne.s32.totalorder %s684_s13, %s680_s12 }
   0xa   : > { %p763_p3 = por %p61_p2, %p60_p1  ;;  %s48_s22 = ssub.s32 %s696_s16, %s934_s19 }
   0xb   : > { %p67_p5 = scmp.eq.s32.totalorder %s503_s18, 0  ;;  %p51_p6 = scmp.eq.s32.totalorder %s48_s22, 0 }
   0xc   : > { %p534_p8 = scmp.lt.s32.totalorder %s700_s17, 2  ;;  %s779_s25 = sand.u32 1, %s688_s14  }
   0xd   : > { %p770_p7 = por %p67_p5, %p66_p4  ;;  %s519_s26 = sshll.u32 %s696_s16, 7 }
   0xe   : > { %s776_s24 = scalar_select %p51_p6, %s688_s14, %s53_s20  }
   0xf   : > { %s924_s23 = scalar_select %p770_p7, 1, 0 }
  0x10   : > { %s507_s27 = sshll.u32 %s779_s25, 3  ;;  %s788_s30 = scalar_lea.hbm %s918_s0, %s519_s26 }
  0x11   : > { %s190_s4 = scalar_lea.vmem [#allocation2], %s507_s27  ;;  %p794_p9 = pnand %p534_p8, %p763_p3 }
  0x12   : > { %s201_s5 = sshll.u32 %s190_s4, 4  ;;  %s187_s7 = scalar_lea.sflag [#allocation3], %s779_s25  ;;  %s798_s5 = int_to_ptr.vmem [resolvable:$true] %s201_s5 }
  0x13   : > { %s586_s8 = scalar_lea.hbm %s788_s30, 128  ;;  %p588_p11 = pneg %p794_p9 }
  0x14   : > { %p587_p10 = scmp.ne.s32.totalorder %s788_s30, %s586_s8  ;;  %s591_s11 = scalar_lea.hbm %s918_s0, 256 }
  0x15   : > { %p592_p0 = scmp.lt.u32.totalorder %s788_s30, %s918_s0  ;;  %p593_p1 = scmp.lt.u32.totalorder %s591_s11, %s586_s8 }
  0x16   : > { %p589_p12 = pnand %p588_p11, %p587_p10  ;;  %p595_p3 = scmp.lt.u32.totalorder %s586_s8, %s788_s30 }
  0x17   : > { %p594_p2 = por %p593_p1, %p592_p0 }
  0x18   : > { %p590_p13 = pneg %p589_p12 }
  0x19   : > { %p596_p4 = por %p595_p3, %p594_p2 }
  0x1b   : > { %p597_p5 = pnand %p596_p4, %p590_p13 }
  0x1d   : > { %600 = shalt.err (!%p597_p5)
}
  0x1e   : > { %s601_s20 = scalar_lea.vmem %s798_s5, 128  ;;  %s702_s21 = smov [#allocation2]  }
  0x1f   : > { %p602_p6 = scmp.ne.s32.totalorder %s798_s5, %s601_s20  ;;  %s606_s22 = sshll.u32 %s702_s21, 4  ;;  %s607_s22 = int_to_ptr.vmem [resolvable:$false] %s606_s22 }
  0x20   : > { %s608_s28 = scalar_lea.vmem %s607_s22, 256  ;;  %p609_p12 = scmp.lt.s32.totalorder %s798_s5, %s607_s22 }
  0x21   : > { %p604_p8 = pnand %p602_p6, %p588_p11  ;;  %p610_p0 = scmp.lt.s32.totalorder %s608_s28, %s601_s20 }
  0x23   : > { %p605_p10 = pneg %p604_p8  ;;  %p611_p1 = por %p610_p0, %p609_p12 }
  0x25   : > { %p612_p2 = pnand %p611_p1, %p605_p10 }
  0x27   : > { %615 = shalt.err (!%p612_p2)
}
  0x28   : > { %s703_s29 = smov 32   ;;  %s704_s4 = smov 2  }
  0x29   : > { %530 = dma.hbm_to_vmem [thread:$0]  (!%p794_p9), %s788_s30, 128, %s798_s5, %s187_s7, %s703_s29, %s703_s29, %s704_s4  }
  0x2a   : > { %p513_p13 = scmp.ge.s32.totalorder %s700_s17, 1  ;;  %p250_p3 = scmp.lt.s32.totalorder %s700_s17, 3 }
  0x2b   : > { %s842_s11 = scalar_lea.hbm %s919_s1, %s519_s26  ;;  %s215_s12 = scalar_lea.vmem [#allocation4], %s507_s27 }
  0x2c   : > { %p833_p4 = pnand %p513_p13, %p250_p3  ;;  %s226_s18 = sshll.u32 %s215_s12, 4  ;;  %s846_s18 = int_to_ptr.vmem [resolvable:$true] %s226_s18 }
  0x2d   : > { %s212_s30 = scalar_lea.sflag [#allocation5], %s779_s25  ;;  %s616_s5 = scalar_lea.hbm %s842_s11, 128 }
  0x2e   : > { %p617_p5 = scmp.ne.s32.totalorder %s842_s11, %s616_s5  ;;  %s621_s26 = scalar_lea.hbm %s919_s1, 256 }
  0x2f   : > { %p622_p10 = scmp.lt.u32.totalorder %s842_s11, %s919_s1  ;;  %p623_p12 = scmp.lt.u32.totalorder %s621_s26, %s616_s5 }
  0x30   : > { %p619_p6 = pnand %p617_p5, %p588_p11  ;;  %p625_p1 = scmp.lt.u32.totalorder %s616_s5, %s842_s11 }
  0x31   : > { %p624_p0 = por %p623_p12, %p622_p10 }
  0x32   : > { %p620_p8 = pneg %p619_p6 }
  0x33   : > { %p626_p2 = por %p625_p1, %p624_p0 }
  0x35   : > { %p627_p13 = pnand %p626_p2, %p620_p8 }
  0x37   : > { %630 = shalt.err (!%p627_p13)
}
  0x38   : > { %s631_s27 = scalar_lea.vmem %s846_s18, 128  ;;  %s705_s28 = smov [#allocation4]  }
  0x39   : > { %p632_p3 = scmp.ne.s32.totalorder %s846_s18, %s631_s27  ;;  %s636_s9 = sshll.u32 %s705_s28, 4  ;;  %s637_s9 = int_to_ptr.vmem [resolvable:$false] %s636_s9 }
  0x3a   : > { %s638_s10 = scalar_lea.vmem %s637_s9, 256  ;;  %p639_p7 = scmp.lt.s32.totalorder %s846_s18, %s637_s9 }
  0x3b   : > { %p634_p5 = pnand %p632_p3, %p588_p11  ;;  %p640_p10 = scmp.lt.s32.totalorder %s638_s10, %s631_s27 }
  0x3d   : > { %p635_p6 = pneg %p634_p5  ;;  %p641_p12 = por %p640_p10, %p639_p7 }
  0x3f   : > { %p642_p0 = pnand %p641_p12, %p635_p6 }
  0x41   : > { %645 = shalt.err (!%p642_p0)
}
  0x42   : > { %533 = dma.hbm_to_vmem [thread:$0]  (!%p794_p9), %s842_s11, 128, %s846_s18, %s212_s30, %s703_s29, %s703_s29, %s704_s4  }
  0x43   : > { %254 = sbr.rel (%p833_p4) target bundleno = 302 (0x12e), region = 32  ;;  %s256_s12 = sand.u32 (!%p833_p4), 1, %s684_s13  }
  0x44   : > { %s514_s5 = sshll.u32 (!%p833_p4), %s256_s12, 3  ;;  %s257_s7 = scalar_lea.sflag (!%p833_p4), [#allocation3], %s256_s12 }
  0x45   : > { %s260_s20 = scalar_lea.vmem (!%p833_p4), [#allocation2], %s514_s5  ;;  %p927_p7 = scmp.ne.s32.totalorder (!%p833_p4), %s924_s23, 0 }
  0x4a   : > { %671 = dma.done.wait (%p927_p7), %s257_s7, 128  }
  0x4b   : > { %673 = vsyncadd (%p927_p7), %s257_s7, 4294967168  ;;  %s266_s6 = scalar_lea.sflag [#allocation5], %s256_s12  ;;  %s269_s25 = scalar_lea.vmem [#allocation4], %s514_s5 }
  0x4c   : > { %675 = dma.done.wait (%p927_p7), %s266_s6, 128  }
  0x4d   : > { %677 = vsyncadd (%p927_p7), %s266_s6, 4294967168  ;;  %p317_p9 = scmp.lt.s32.totalorder %s692_s15, 1  ;;  %v339_v0 = vld [vmem:[%s260_s20] sm:$0x3]  ;;  %v340_v1 = vld [vmem:[%s260_s20 + $0x2] sm:$0x3] }
  0x4e   : > { %v341_v2 = vld [vmem:[%s260_s20 + $0x4] sm:$0x3]  ;;  %v342_v3 = vld [vmem:[%s260_s20 + $0x6] sm:$0x3]  ;;  %v343_v4 = vld [vmem:[%s269_s25] sm:$0x3] }
  0x4f   : > { %s936_s15 = smov (!%p317_p9, %s692_s15), 1  ;;  %v344_v5 = vld [vmem:[%s269_s25 + $0x2] sm:$0x3]  ;;  %v345_v6 = vld [vmem:[%s269_s25 + $0x4] sm:$0x3]  ;;  %v347_v8 = vsub.f32 %v339_v0, %v343_v4  ;;  %vm355_vm0 = vcmask 1041408  }
  0x50   : > { %s516_s29 = sshll.u32 %s936_s15, 1  ;;  %v346_v7 = vld [vmem:[%s269_s25 + $0x6] sm:$0x3]  ;;  %v348_v9 = vsub.f32 %v340_v1, %v344_v5  ;;  %v349_v10 = vsub.f32 %v341_v2, %v345_v6  ;;  %s332_s30 = scalar_lea.vmem %s921_s3, %s936_s15  ;;  %vm337_vm1 = vcmask 0   ;;  %v706_v27 = vmov 0.0  }
  0x51   : > { %s323_s8 = scalar_lea.vmem %s920_s2, %s516_s29  ;;  %v350_v11 = vsub.f32 %v342_v3, %v346_v7  ;;  %v351_v12 = vand.u32 2147483647, %v347_v8  ;;  %338 = vst.msk [vmem:[%s332_s30] sm:$0x1] %vm337_vm1, %v706_v27 }
  0x52   : > { %v352_v13 = vand.u32 2147483647, %v348_v9  ;;  %v353_v14 = vand.u32 2147483647, %v349_v10  ;;  %v363_v18 = vld [vmem:[%s323_s8] sm:$0x3] }
  0x53   : > { %v354_v15 = vand.u32 2147483647, %v350_v11  ;;  %v356_v16 = vsel %vm355_vm0, %v351_v12, 0.0  ;;  %v364_v23 = vand.u32 2147483647, %v363_v18 }
  0x54   : > { %v357_v17 = vsel %vm355_vm0, %v352_v13, 0.0  ;;  %v359_v20 = vsel %vm355_vm0, %v353_v14, 0.0 }
  0x55   : > { %v358_v19 = vadd.f32 %v357_v17, %v356_v16  ;;  %v361_v21 = vsel %vm355_vm0, %v354_v15, 0.0 }
  0x57   : > { %v360_v22 = vadd.f32 %v359_v20, %v358_v19 }
  0x58   : > { %v366_v35 = vld [vmem:[%s332_s30] sm:$0x1] }
  0x59   : > { %v362_v24 = vadd.f32 %v361_v21, %v360_v22 }
  0x5b   : > { %v365_v25 = vmul.f32 %v364_v23, %v362_v24 }
  0x5d   : > { %v367_v26 = vsel %vm355_vm0, %v365_v25, 0.0 }
  0x5e   : > { %368 = vadd.xlane.f32.xlu0 %v367_v26 }
  0xeb   : > { %v369_v28 = vpop.xlane.xlu0 %368 }
  0xec   : > { %v370_v29 = vrot.slane %v369_v28, 4 }
  0xee   : > { %v371_v30 = vadd.f32 %v370_v29, %v369_v28 }
  0xf0   : > { %v372_v31 = vrot.slane %v371_v30, 2 }
  0xf2   : > { %v373_v32 = vadd.f32 %v372_v31, %v371_v30 }
  0xf4   : > { %v374_v33 = vrot.slane %v373_v32, 1 }
  0xf6   : > { %v375_v34 = vadd.f32 %v374_v33, %v373_v32 }
  0xf8   : > { %521 = vpush %v375_v34 }
 0x129   : > { %s522_s26 = spop %521 }
 0x12a   : > { %v377_v36 = vstv %s522_s26 }
 0x12b   : > { %v378_v37 = vadd.f32 %v377_v36, %v366_v35 }
 0x12d   : > { %380 = vst.msk [vmem:[%s332_s30] sm:$0x1] %vm337_vm1, %v378_v37 }
 0x12e PF: > { %s19_s17 = sadd.s32 1, %s700_s17   ;;  %s928_s12 = smov %s684_s13 }
 0x12f   : > { %p16_p11 = scmp.ge.s32.totalorder %s19_s17, 4   ;;  %s929_s13 = smov %s688_s14 }
 0x130   : > { %s930_s14 = smov %s776_s24  ;;  %s931_s15 = smov %s696_s16 }
 0x131   : > { %s932_s16 = smov %s934_s19  ;;  %18 = sbr.rel (!%p16_p11) target bundleno = 6 (0x6), region = 92 }
 0x138   :  { %404 = vsyncpa [#allocation3], 1 }
 0x139   :  { %406 = vsyncpa [#allocation3 + $0x1], 1 }
 0x13a   :  { %407 = vsyncpa [#allocation5], 1 }
 0x13b   :  { %409 = vsyncpa [#allocation5 + $0x1], 1 }

</bundles_post_ra>
